<compile_context>
chip_gen: v5e
topology: v5e:2x2
jax: 0.10.0
libtpu: 0.0.40
codegen_flags: <defaults>
</compile_context>

<pallas_src>
import functools

import numpy as np
import jax
import jax.numpy as jnp
from jax.experimental import pallas as pl
from jax.experimental.pallas import tpu as pltpu


# ----------------------------------------------------------------------------
# Fused kernel: avg-pool (lane reduce) + tiny 1x1 fc (+bias) + sigmoid + rescale.
# One (Bt, C, HWp) batch block per grid step.
# ----------------------------------------------------------------------------
def _channel_attention_kernel(x_ref, wt_ref, b_ref, o_ref, *, inv_hw):
    # x_ref: (Bt, C, HWp) native dtype   wt_ref: (C_in, C_out) f32
    # b_ref: (1, C) f32                  o_ref: (Bt, C, HWp) native dtype
    x = x_ref[...].astype(jnp.float32)                            # upcast in-kernel
    # Pool first: padded lanes are zero and the divisor is the true HW, so the
    # zero-padding never biases the mean.
    pooled = jnp.sum(x, axis=2) * inv_hw                          # (Bt, C)  XLU reduce
    # 1x1 conv == dense layer on the pooled vector: one small MXU matmul.
    pre = jnp.dot(pooled, wt_ref[...],
                  preferred_element_type=jnp.float32) + b_ref[...]  # (Bt, C)
    att = jax.nn.sigmoid(pre)                                     # (Bt, C)  EUP
    o_ref[...] = (x * att[:, :, None]).astype(o_ref.dtype)        # lane-broadcast


# ----------------------------------------------------------------------------
# Wrapper: NCHW in / NCHW out, native dtype end to end.
# ----------------------------------------------------------------------------
def channel_attention_forward(x_nchw, w_fc, b_fc, *, target_block_bytes=2 << 20):
    """x_nchw: (B, C, H, W). w_fc: (C, C, 1, 1). b_fc: (C,). Returns (B, C, H, W)."""
    B, C, H, W = x_nchw.shape
    HW = H * W
    dtype = x_nchw.dtype

    # Lane-dense layout straight from NCHW (free reshape: H, W are contiguous).
    x = x_nchw.reshape(B, C, HW)

    # Pad lane dim to a 128 multiple so output stores are unmasked (lane-dense).
    HWp = ((HW + 127) // 128) * 128
    if HWp != HW:
        x = jnp.pad(x, ((0, 0), (0, 0), (0, HWp - HW)))

    # fc params: pre-transpose so the kernel does pooled @ W^T + b in one matmul.
    wt = w_fc.reshape(C, C).T.astype(jnp.float32)      # (C_in, C_out)
    b = b_fc.reshape(1, C).astype(jnp.float32)

    # Batch blocking: ~target_block_bytes per x block (step-overhead amortization),
    # capped at B//2 so grid length >= 2 and both v7x TensorCores get work.
    itemsize = jnp.dtype(dtype).itemsize
    bytes_per_b = max(1, C * HWp * itemsize)
    bt_cap = max(1, target_block_bytes // bytes_per_b)
    if B >= 2:
        bt_cap = min(bt_cap, B // 2)
    bt = 1
    for d in range(1, B + 1):                          # largest divisor of B <= cap
        if B % d == 0 and d <= bt_cap:
            bt = d
    grid = (B // bt,)

    out = pl.pallas_call(
        functools.partial(_channel_attention_kernel, inv_hw=1.0 / HW),
        out_shape=jax.ShapeDtypeStruct((B, C, HWp), dtype),
        grid=grid,
        in_specs=[
            pl.BlockSpec((bt, C, HWp), lambda i: (i, 0, 0)),   # batch block of x
            pl.BlockSpec((C, C), lambda i: (0, 0)),            # fc weight (resident)
            pl.BlockSpec((1, C), lambda i: (0, 0)),            # fc bias   (resident)
        ],
        out_specs=pl.BlockSpec((bt, C, HWp), lambda i: (i, 0, 0)),
        compiler_params=pltpu.CompilerParams(
            dimension_semantics=("parallel",),
            vmem_limit_bytes=32 * 1024 * 1024,
        ),
    )(x, wt, b)

    if HWp != HW:
        out = out[..., :HW]
    return out.reshape(B, C, H, W)


# ----------------------------------------------------------------------------
# Pure-JAX reference (correctness check only)
# ----------------------------------------------------------------------------
def _reference(x, w_fc, b_fc):
    C = w_fc.shape[0]
    pooled = jnp.mean(x.astype(jnp.float32), axis=(2, 3))         # (B, C)
    att = pooled @ w_fc.reshape(C, C).T.astype(jnp.float32) + b_fc[None, :]
    return (x.astype(jnp.float32) * jax.nn.sigmoid(att)[:, :, None, None]).astype(x.dtype)


if __name__ == "__main__":
    B, C, H, W = 2, 32, 16, 16

    key = jax.random.PRNGKey(0)
    k1, k2, k3 = jax.random.split(key, 3)
    x = jax.random.normal(k1, (B, C, H, W), jnp.float32)
    w_fc = jax.random.normal(k2, (C, C, 1, 1), jnp.float32) * 0.2
    b_fc = jax.random.normal(k3, (C,), jnp.float32) * 0.1

    out = channel_attention_forward(x, w_fc, b_fc)
    out = jax.block_until_ready(out)

    ref = _reference(x, w_fc, b_fc)
    np.testing.assert_allclose(np.asarray(out), np.asarray(ref), rtol=2e-3, atol=2e-3)

    print("KERNEL_OK")
</pallas_src>

<mosaic_0001>
module attributes {stable_mosaic.version = 11 : i64} {
  func.func @_channel_attention_kernel(%arg0: i32, %arg1: memref<1x32x256xf32, #tpu.memory_space<vmem>>, %arg2: memref<32x32xf32, #tpu.memory_space<vmem>>, %arg3: memref<1x32xf32, #tpu.memory_space<vmem>>, %arg4: memref<1x32x256xf32, #tpu.memory_space<vmem>>) attributes {dimension_semantics = [#tpu.dimension_semantics<parallel>], iteration_bounds = array<i64: 2>, scalar_prefetch = 0 : i64, scratch_operands = 0 : i64, tpu.core_type = #tpu.core_type<tc>, window_params = [{transform_indices = @transform_0, window_bounds = array<i64: 1, 32, 256>}, {pipeline_mode = #tpu.pipeline_mode<synchronous>, transform_indices = @transform_1, window_bounds = array<i64: 32, 32>}, {pipeline_mode = #tpu.pipeline_mode<synchronous>, transform_indices = @transform_2, window_bounds = array<i64: 1, 32>}, {transform_indices = @transform_3, window_bounds = array<i64: 1, 32, 256>}]} {
    %c0 = arith.constant 0 : index
    %c0_0 = arith.constant 0 : index
    %c0_1 = arith.constant 0 : index
    %0 = vector.load %arg1[%c0, %c0_0, %c0_1] : memref<1x32x256xf32, #tpu.memory_space<vmem>>, vector<1x32x256xf32>
    %cst = arith.constant dense<0.000000e+00> : vector<1x32xf32>
    %1 = vector.multi_reduction <add>, %0, %cst [2] : vector<1x32x256xf32> to vector<1x32xf32>
    %cst_2 = arith.constant 3.906250e-03 : f32
    %2 = vector.broadcast %cst_2 : f32 to vector<1x32xf32>
    %3 = arith.mulf %1, %2 : vector<1x32xf32>
    %c0_3 = arith.constant 0 : index
    %c0_4 = arith.constant 0 : index
    %4 = vector.load %arg2[%c0_3, %c0_4] : memref<32x32xf32, #tpu.memory_space<vmem>>, vector<32x32xf32>
    %cst_5 = arith.constant dense<0.000000e+00> : vector<1x32xf32>
    %5 = tpu.matmul %3, %4, %cst_5 {dimension_numbers = #tpu.dot_dimension_numbers<[1], [0], [0], [1], [0, 0, 1, 1], [], []>} : vector<1x32xf32>, vector<32x32xf32>, vector<1x32xf32> -> vector<1x32xf32>
    %c0_6 = arith.constant 0 : index
    %c0_7 = arith.constant 0 : index
    %6 = vector.load %arg3[%c0_6, %c0_7] : memref<1x32xf32, #tpu.memory_space<vmem>>, vector<1x32xf32>
    %7 = arith.addf %5, %6 : vector<1x32xf32>
    %8 = arith.negf %7 : vector<1x32xf32>
    %9 = math.exp %8 : vector<1x32xf32>
    %cst_8 = arith.constant 1.000000e+00 : f32
    %10 = vector.broadcast %cst_8 : f32 to vector<1x32xf32>
    %11 = arith.addf %10, %9 : vector<1x32xf32>
    %12 = arith.divf %10, %11 : vector<1x32xf32>
    %13 = vector.shape_cast %12 : vector<1x32xf32> to vector<1x32x1xf32>
    %14 = vector.broadcast %13 : vector<1x32x1xf32> to vector<1x32x256xf32>
    %15 = arith.mulf %0, %14 : vector<1x32x256xf32>
    %c0_9 = arith.constant 0 : index
    %c0_10 = arith.constant 0 : index
    %c0_11 = arith.constant 0 : index
    %16 = vector.load %arg4[%c0_9, %c0_10, %c0_11] : memref<1x32x256xf32, #tpu.memory_space<vmem>>, vector<1x32x256xf32>
    tpu.vector_store %arg4[%c0_9, %c0_10, %c0_11], %15 {strides = array<i32>} : memref<1x32x256xf32, #tpu.memory_space<vmem>>, vector<1x32x256xf32>,
    return
  }
  func.func @transform_0(%arg0: i32) -> (i32, i32, i32) {
    %c0_i32 = arith.constant 0 : i32
    %c0_i32_0 = arith.constant 0 : i32
    %c0_i32_1 = arith.constant 0 : i32
    return %arg0, %c0_i32, %c0_i32_0 : i32, i32, i32
  }
  func.func @transform_1(%arg0: i32) -> (i32, i32) {
    %c0_i32 = arith.constant 0 : i32
    %c0_i32_0 = arith.constant 0 : i32
    %c0_i32_1 = arith.constant 0 : i32
    return %c0_i32, %c0_i32_0 : i32, i32
  }
  func.func @transform_2(%arg0: i32) -> (i32, i32) {
    %c0_i32 = arith.constant 0 : i32
    %c0_i32_0 = arith.constant 0 : i32
    %c0_i32_1 = arith.constant 0 : i32
    return %c0_i32, %c0_i32_0 : i32, i32
  }
  func.func @transform_3(%arg0: i32) -> (i32, i32, i32) {
    %c0_i32 = arith.constant 0 : i32
    %c0_i32_0 = arith.constant 0 : i32
    %c0_i32_1 = arith.constant 0 : i32
    return %arg0, %c0_i32, %c0_i32_0 : i32, i32, i32
  }
}

</mosaic_0001>

<bundles_post_ra>
// kernel: tpu_custom_call.1
= control target key start
LH: loop header
LB: loop body
LE: loop exit
PB: predicated region body
PF: predicated region fallthrough
CT: control target
= control target key end

     0   :  { %8 = vsyncpa [#allocation3], 0  ;;  %s868_s0 = inlined_call_operand.hbm [shape: f32[2,32,256], index: 0, kind: input, shape index: {}]   ;;  %s869_s1 = inlined_call_operand.hbm [shape: f32[32,32], index: 1, kind: input, shape index: {}]   ;;  %s870_s2 = inlined_call_operand.vmem [shape: f32[1,32], index: 2, kind: input, shape index: {}]   ;;  %s871_s3 = inlined_call_operand.hbm [shape: f32[2,32,256], index: 3, kind: output, shape index: {}]  }
   0x1   :  { %10 = vsyncpa [#allocation3 + $0x1], 0 }
   0x2   :  { %11 = vsyncpa [#allocation6], 0 }
   0x3   :  { %12 = vsyncpa [#allocation4], 0 }
   0x4   :  { %14 = vsyncpa [#allocation4 + $0x1], 0  ;;  %s689_s12 = smov 0   ;;  %s691_s13 = smov 0  }
   0x5   :  { %s693_s14 = smov 0   ;;  %s695_s15 = smov 0  }
   0x6 LB: > { %s710_s16 = sadd.s32 4294967295, %s660_s15   ;;  %s438_s17 = sadd.s32 4294967294, %s660_s15   ;;  %s660_s15 = sphi %s695_s15, %s881_s15   ;;  %s656_s14 = sphi %s693_s14, %s880_s14   ;;  %s652_s13 = sphi %s691_s13, %s879_s13   ;;  %s648_s12 = sphi %s689_s12, %s878_s12  }
   0x7   : > { %p40_p0 = scmp.ne.s32.totalorder %s652_s13, %s648_s12  ;;  %p41_p1 = scmp.eq.s32.totalorder %s710_s16, 0 }
   0x8   : > { %p106_p2 = scmp.eq.s32.totalorder %s710_s16, 1  ;;  %p112_p3 = scmp.eq.s32.totalorder %s438_s17, 1 }
   0x9   : > { %p719_p4 = por %p41_p1, %p40_p0  ;;  %p439_p5 = scmp.ge.s32.totalorder %s660_s15, 1 }
   0xa   : > { %p724_p6 = por %p112_p3, %p40_p0  ;;  %p119_p7 = scmp.lt.s32.totalorder %s660_s15, 3 }
   0xb   : > { %s130_s22 = sshll.u32 %s869_s1, 4  ;;  %s662_s24 = smov [#allocation5]   ;;  %s131_s22 = int_to_ptr.hbm [resolvable:$true] %s130_s22 }
   0xc   : > { %p732_p8 = pnand %p439_p5, %p119_p7  ;;  %s132_s25 = sshll.u32 %s662_s24, 4  ;;  %s133_s25 = int_to_ptr.vmem [resolvable:$true] %s132_s25 }
   0xd   : > { %s742_s26 = sadd.s32 1, %s660_s15   ;;  %s663_s27 = smov 128  }
   0xe   : > { %p466_p9 = pneg %p732_p8  ;;  %s664_s28 = smov 8  }
   0xf   : > { %s24_s29 = ssub.s32 %s660_s15, %s742_s26  ;;  %s27_s30 = sadd.s32 1, %s656_s14 }
  0x10   : > { %p467_p10 = pnand %p466_p9, %p41_p1  ;;  %p25_p12 = scmp.eq.s32.totalorder %s24_s29, 0 }
  0x11   : > { %p34_p13 = scmp.ne.s32.totalorder %s656_s14, %s652_s13  ;;  %p35_p0 = scmp.eq.s32.totalorder %s660_s15, 0 }
  0x12   : > { %469 = dma.hbm_to_vmem [thread:$0]  (!%p467_p10), %s131_s22, 512, %s133_s25, [#allocation6], %s663_s27, %s663_s27, %s664_s28  }
  0x13   : > { %p479_p3 = scmp.lt.s32.totalorder %s660_s15, 2  ;;  %p36_p5 = por %p35_p0, %p34_p13 }
  0x14   : > { %s752_s4 = scalar_select %p25_p12, %s656_s14, %s27_s30  }
  0x15   : > { %p756_p7 = por %p106_p2, %p34_p13  ;;  %s149_s6 = sand.u32 1, %s656_s14  }
  0x16   : > { %s456_s7 = sshll.u32 %s660_s15, 6  ;;  %s442_s8 = sshll.u32 %s149_s6, 6 }
  0x17   : > { %s158_s11 = scalar_lea.hbm %s868_s0, %s456_s7  ;;  %s153_s20 = scalar_lea.vmem [#allocation2], %s442_s8 }
  0x18   : > { %s159_s17 = sshll.u32 %s158_s11, 4  ;;  %s161_s21 = sshll.u32 %s153_s20, 4  ;;  %s160_s17 = int_to_ptr.hbm [resolvable:$true] %s159_s17  ;;  %s162_s21 = int_to_ptr.vmem [resolvable:$true] %s161_s21 }
  0x19   : > { %p767_p9 = pnand %p479_p3, %p36_p5  ;;  %s150_s24 = scalar_lea.sflag [#allocation3], %s149_s6 }
  0x1a   : > { %s560_s25 = sshra.s32 %s160_s17, 4  ;;  %s567_s30 = scalar_lea.hbm %s868_s0, 128  ;;  %s561_s25 = int_to_ptr.hbm [resolvable:$true] %s560_s25 }
  0x1b   : > { %s562_s27 = scalar_lea.hbm %s561_s25, 64  ;;  %p564_p10 = pneg %p767_p9 }
  0x1c   : > { %p563_p2 = scmp.ne.s32.totalorder %s561_s25, %s562_s27  ;;  %p568_p0 = scmp.lt.s32.totalorder %s561_s25, %s868_s0 }
  0x1d   : > { %p569_p3 = scmp.lt.s32.totalorder %s567_s30, %s562_s27 }
  0x1e   : > { %p565_p12 = pnand %p564_p10, %p563_p2 }
  0x1f   : > { %p570_p5 = por %p569_p3, %p568_p0 }
  0x20   : > { %p566_p13 = pneg %p565_p12 }
  0x22   : > { %p571_p11 = pnand %p570_p5, %p566_p13 }
  0x24   : > { %574 = shalt.err (!%p571_p11)
}
  0x25   : > { %s665_s6 = smov 256   ;;  %s666_s9 = smov 16  }
  0x26   : > { %473 = dma.hbm_to_vmem [thread:$0]  (!%p767_p9), %s160_s17, 1024, %s162_s21, %s150_s24, %s665_s6, %s665_s6, %s666_s9  }
  0x27   : > { %173 = sbr.rel (%p732_p8) target bundleno = 463 (0x1cf), region = 32  ;;  %s784_s10 = sand.u32 (!%p732_p8), 1, %s652_s13  }
  0x28   : > { %s446_s11 = sshll.u32 (!%p732_p8), %s784_s10, 6  ;;  %s176_s20 = scalar_lea.sflag (!%p732_p8), [#allocation3], %s784_s10 }
  0x29   : > { %s179_s25 = scalar_lea.vmem (!%p732_p8), [#allocation2], %s446_s11 }
  0x2c   : > { %635 = dma.done.wait (%p719_p4), %s176_s20, 1024  }
  0x2d   : > { %637 = vsyncadd (%p719_p4), %s176_s20, 4294966272 }
  0x2e   : > { %639 = dma.done.wait (%p41_p1), [#allocation6], 512  }
  0x2f   : > { %641 = vsyncadd (%p41_p1), [#allocation6], 4294966784  ;;  %v798_v0 = vld [vmem:[%s179_s25] sm:$0xff]  ;;  %v800_v1 = vld [vmem:[%s179_s25 + $0x8] sm:$0xff]  ;;  %v241_v16 = vlaneseq  ;;  %vm246_vm0 = vcmask 130112   ;;  %vm250_vm1 = vcmask 195712  }
  0x30   : > { %v802_v2 = vld [vmem:[%s179_s25 + $0x20] sm:$0xff]  ;;  %v216_v3 = vadd.f32 %v800_v1, %v798_v0  ;;  %v806_v4 = vld [vmem:[%s179_s25 + $0x28] sm:$0xff]  ;;  %v810_v6 = vld [vmem:[%s179_s25 + $0x10] sm:$0xff]  ;;  %vm254_vm2 = vcmask 261312   ;;  %vm256_vm3 = vcmask 261120   ;;  %s207_s17 = scalar_lea.vmem [#allocation7], %s446_s11 }
  0x31   : > { %v222_v5 = vadd.f32 %v806_v4, %v802_v2  ;;  %v812_v7 = vld [vmem:[%s179_s25 + $0x18] sm:$0xff]  ;;  %v814_v8 = vld [vmem:[%s179_s25 + $0x30] sm:$0xff]  ;;  %v233_v14 = vld [vmem:[#allocation5 + $0x8] sm:$0xff]  ;;  %v242_v19 = vand.u32 127, %v241_v16  ;;  %v300_v36 = vshrl.u32 %v241_v16, 7  ;;  %s457_s21 = sshll.u32 %s710_s16, 6 }
  0x32   : > { %217 = vadd.xlane.f32.xlu0 %v216_v3  ;;  %v816_v9 = vld [vmem:[%s179_s25 + $0x38] sm:$0xff]  ;;  %v219_v10 = vadd.f32 %v812_v7, %v810_v6  ;;  %v234_v13 = vld [vmem:[#allocation5 + $0x10] sm:$0xff]  ;;  %v232_v15 = vld [vmem:[#allocation5] sm:$0xff]  ;;  %s351_s27 = scalar_lea.hbm %s871_s3, %s457_s21  ;;  %s352_s28 = sshll.u32 %s207_s17, 4  ;;  %s353_s28 = int_to_ptr.vmem [resolvable:$true] %s352_s28 }
  0x33   : > { %223 = vadd.xlane.f32.xlu1 %v222_v5  ;;  %v225_v11 = vadd.f32 %v816_v9, %v814_v8  ;;  %v235_v12 = vld [vmem:[#allocation5 + $0x18] sm:$0xff]  ;;  %v244_v21 = vadd.s32 4294967288, %v242_v19  ;;  %v248_v22 = vadd.s32 4294967280, %v242_v19  ;;  %v252_v25 = vadd.s32 4294967272, %v242_v19  ;;  %521 = vset.pattern.permute.xlu2 %v300_v36  ;;  %v236_v39 = vld [vmem:[%s870_s2] sm:$0x1] }
  0x34   : > { %271 = vmatpush.msra.mxu0 %v235_v12  ;;  %v319_v37 = vadd.s32 24, %v300_v36  ;;  %v313_v38 = vadd.s32 16, %v300_v36  ;;  %v307_v56 = vadd.s32 8, %v300_v36  ;;  %s354_s29 = sshll.u32 %s351_s27, 4  ;;  %s340_s16 = scalar_lea.sflag [#allocation4], %s784_s10  ;;  %s355_s29 = int_to_ptr.hbm [resolvable:$true] %s354_s29 }
  0x35   : > { %s604_s30 = sshra.s32 %s355_s29, 4  ;;  %s610_s9 = scalar_lea.hbm %s871_s3, 128  ;;  %s605_s30 = int_to_ptr.hbm [resolvable:$true] %s604_s30 }
  0x36   : > { %272 = vmatpush.msra.mxu0 %v234_v13  ;;  %524 = vset.pattern.permute.xlu1 %v319_v37  ;;  %s606_s7 = scalar_lea.hbm %s605_s30, 64  ;;  %p611_p11 = scmp.lt.s32.totalorder %s605_s30, %s871_s3 }
  0x37   : > { %523 = vset.pattern.permute.xlu0 %v313_v38  ;;  %p607_p1 = scmp.ne.s32.totalorder %s605_s30, %s606_s7  ;;  %p612_p9 = scmp.lt.s32.totalorder %s610_s9, %s606_s7 }
  0x38   : > { %273 = vmatpush.msra.mxu0 %v233_v14 }
  0x39   : > { %p608_p4 = pnand %p607_p1, %p756_p7  ;;  %p613_p2 = por %p612_p9, %p611_p11 }
  0x3a   : > { %220 = vadd.xlane.f32.xlu0 %v219_v10  ;;  %274 = vmatpush.msra.mxu0 %v232_v15 }
  0x3b   : > { %226 = vadd.xlane.f32.xlu1 %v225_v11  ;;  %p609_p8 = pneg %p608_p4 }
  0x3d   : > { %p614_p10 = pnand %p613_p2, %p609_p8 }
  0xa5   : > { %v218_v17 = vpop.xlane.xlu0 %217 }
  0xa6   : > { %v224_v18 = vpop.xlane.xlu1 %223  ;;  %v228_v20 = vmul.f32 0.00390625, %v218_v17 }
  0xa7   : > { %v230_v23 = vmul.f32 0.00390625, %v224_v18 }
  0xa8   : > { %v243_v29 = vperm.slane %v228_v20, %v242_v19 }
  0xa9   : > { %v249_v31 = vperm.slane %v230_v23, %v248_v22 }
  0xad   : > { %v221_v24 = vpop.xlane.xlu0 %220 }
  0xae   : > { %v229_v26 = vmul.f32 0.00390625, %v221_v24  ;;  %v227_v27 = vpop.xlane.xlu1 %226 }
  0xaf   : > { %v231_v28 = vmul.f32 0.00390625, %v227_v27 }
  0xb0   : > { %v245_v30 = vperm.slane %v229_v26, %v244_v21 }
  0xb1   : > { %v253_v32 = vperm.slane %v231_v28, %v252_v25 }
  0xb2   : > { %v247_v33 = vsel %vm246_vm0, %v245_v30, %v243_v29 }
  0xb3   : > { %v251_v34 = vsel %vm250_vm1, %v249_v31, %v247_v33 }
  0xb4   : > { %v255_v35 = vsel %vm254_vm2, %v253_v32, %v251_v34 }
  0xb5   : > { %449 = vmatmul.msk.f32.vlgmr.msra.gmra.mxu0 %vm256_vm3, %v255_v35 }
 0x132   : > { %v276_v40 = vpop.f32.mrf.mxu0 }
 0x133   : > { %v277_v41 = vadd.f32 %v276_v40, %v236_v39 }
 0x135   : > { %v450_v42 = vmul.f32 -1.442695, %v277_v41 }
 0x137   : > { %526 = vpow2.f32 %v450_v42 }
 0x13d   : > { %v527_v43 = vpop.eup %526 }
 0x13e   : > { %v282_v44 = vadd.f32 1.0, %v527_v43 }
 0x140   : > { %528 = vrcp.f32 %v282_v44  ;;  %v294_v48 = vand.u32 2147483648, %v282_v44  ;;  %v292_v50 = vand.u32 2147483647, %v282_v44  ;;  %vm288_vm5 = vweird.f32 %v282_v44 }
 0x142   : > { %v295_v52 = vor.u32 1.1754944e-38, %v294_v48  ;;  %vm293_vm7 = vcmp.eq.f32.partialorder %v292_v50, 8.507059e+37 }
 0x146   : > { %v529_v45 = vpop.eup %528 }
 0x147   : > { %v284_v46 = vmul.f32 %v529_v45, %v282_v44  ;;  %vm289_vm4 = vweird.f32 %v529_v45 }
 0x148   : > { %vm290_vm6 = vmor %vm288_vm5, %vm289_vm4 }
 0x149   : > { %v285_v47 = vsub.f32 1.0, %v284_v46 }
 0x14b   : > { %v286_v49 = vmul.f32 %v529_v45, %v285_v47 }
 0x14d   : > { %v287_v51 = vadd.f32 %v529_v45, %v286_v49 }
 0x14f   : > { %v291_v53 = vsel %vm290_vm6, %v529_v45, %v287_v51 }
 0x150   : > { %v296_v54 = vsel %vm293_vm7, %v295_v52, %v291_v53 }
 0x151   : > { %v298_v55 = vperm.slane %v296_v54, 0 }
 0x153   : > { %321 = vperm.xlu1 %524, %v298_v55   ;;  %315 = vperm.xlu0 %523, %v298_v55  }
 0x154   : > { %303 = vperm.xlu2 %521, %v298_v55  }
 0x15b   : > { %525 = vset.pattern.permute.xlu0 %v319_v37 }
 0x15c   : > { %522 = vset.pattern.permute.xlu2 %v307_v56 }
 0x164   : > { %309 = vperm.xlu2 %522, %v298_v55  }
 0x1ae   : > { %v304_v57 = vpop.permute.xlu2 %303 }
 0x1af   : > { %v323_v58 = vmul.f32 %v304_v57, %v798_v0  ;;  %v324_v59 = vmul.f32 %v304_v57, %v800_v1 }
 0x1b1   : > { %331 = vst [vmem:[%s207_s17] sm:$0xff] %v323_v58 }
 0x1b2   : > { %332 = vst [vmem:[%s207_s17 + $0x8] sm:$0xff] %v324_v59 }
 0x1be   : > { %v310_v60 = vpop.permute.xlu2 %309 }
 0x1bf   : > { %v325_v61 = vmul.f32 %v310_v60, %v810_v6  ;;  %v326_v62 = vmul.f32 %v310_v60, %v812_v7 }
 0x1c1   : > { %333 = vst [vmem:[%s207_s17 + $0x10] sm:$0xff] %v325_v61 }
 0x1c2   : > { %334 = vst [vmem:[%s207_s17 + $0x18] sm:$0xff] %v326_v62 }
 0x1c5   : > { %v322_v63 = vpop.permute.xlu1 %321  ;;  %v316_v0 = vpop.permute.xlu0 %315 }
 0x1c6   : > { %v329_v1 = vmul.f32 %v322_v63, %v814_v8  ;;  %v330_v3 = vmul.f32 %v322_v63, %v816_v9  ;;  %v327_v5 = vmul.f32 %v316_v0, %v802_v2  ;;  %v328_v6 = vmul.f32 %v316_v0, %v806_v4 }
 0x1c8   : > { %337 = vst [vmem:[%s207_s17 + $0x30] sm:$0xff] %v329_v1 }
 0x1c9   : > { %338 = vst [vmem:[%s207_s17 + $0x38] sm:$0xff] %v330_v3 }
 0x1ca   : > { %335 = vst [vmem:[%s207_s17 + $0x20] sm:$0xff] %v327_v5 }
 0x1cb   : > { %336 = vst [vmem:[%s207_s17 + $0x28] sm:$0xff] %v328_v6 }
 0x1cc   : > { %617 = shalt.err (!%p614_p10)
}
 0x1cd   : > { %s667_s10 = smov 256   ;;  %s668_s25 = smov 16  }
 0x1ce   : > { %464 = dma.vmem_to_hbm [thread:$0]  (%p756_p7), %s353_s28, 1024, %s355_s29, %s340_s16, %s667_s10, %s667_s10, %s668_s25  }
 0x1cf PF: > { %s369_s18 = sand.u32 1, %s648_s12   ;;  %p877_p12 = scmp.ge.s32.totalorder %s660_s15, 2 }
 0x1d0   : > { %s370_s23 = scalar_lea.sflag [#allocation4], %s369_s18 }
 0x1d1   : > { %p475_p13 = pnand %p877_p12, %p724_p6 }
 0x1d3   : > { %p476_p0 = pneg %p475_p13 }
 0x1d5   : > { %643 = dma.done.wait (%p476_p0), %s370_s23, 1024  }
 0x1d6   : > { %645 = vsyncadd (%p476_p0), %s370_s23, 4294966272  ;;  %p17_p3 = scmp.ge.s32.totalorder %s742_s26, 4   ;;  %s878_s12 = smov %s652_s13 }
 0x1d7   : > { %s879_s13 = smov %s656_s14  ;;  %s880_s14 = smov %s752_s4 }
 0x1d8   : > { %s881_s15 = smov %s742_s26  ;;  %19 = sbr.rel (!%p17_p3) target bundleno = 6 (0x6), region = 81 }
 0x1dd   :  { %376 = vsyncpa [#allocation3], 1 }
 0x1de   :  { %378 = vsyncpa [#allocation3 + $0x1], 1 }
 0x1df   :  { %379 = vsyncpa [#allocation6], 1 }
 0x1e0   :  { %380 = vsyncpa [#allocation4], 1 }
 0x1e1   :  { %382 = vsyncpa [#allocation4 + $0x1], 1 }

</bundles_post_ra>
